<compile_context>
chip_gen: v6e
topology: v6e:2x2x1
jax: 0.10.0
libtpu: 0.0.40
codegen_flags: <defaults>
</compile_context>

<pallas_src>
import jax
import jax.numpy as jnp
from jax.experimental import pallas as pl
from jax.experimental.pallas import tpu as pltpu


LANES = 128
SUBLANES = 8
NCORES = 2                 # "parallel" axis size (megacore split on v7x)
DEFAULT_TILE_ROWS = 2048   # 2048 * 128 * 4B = 1 MiB f32 block per input


def _cdiv(a: int, b: int) -> int:
    return -(-a // b)


def _round_up(a: int, b: int) -> int:
    return _cdiv(a, b) * b


def _make_mse_sum_kernel(tile_rows: int, bpc: int, rows: int, needs_mask: bool):
    """Kernel accumulating sum((pred - tgt)^2) into a per-core (tile_rows, 128) block.

    Closes over Python ints/bools only (no traced constants -> no captured-const
    error). Division by the true element count is done in the wrapper.
    """

    def mse_kernel(pred_ref, tgt_ref, out_ref):
        c = pl.program_id(0)   # core / parallel axis
        i = pl.program_id(1)   # sequential reduction axis

        @pl.when(i == 0)
        def _init():
            out_ref[...] = jnp.zeros_like(out_ref)

        d = pred_ref[...].astype(jnp.float32) - tgt_ref[...].astype(jnp.float32)
        dd = d * d

        if needs_mask:
            # Mask rows past the real data (partial last block and/or the
            # clamped duplicate blocks of the second core). Garbage data in the
            # out-of-range region is zeroed before accumulation.
            local_row = jax.lax.broadcasted_iota(jnp.int32, (tile_rows, LANES), 0)
            global_row = (c * bpc + i) * tile_rows + local_row
            dd = jnp.where(global_row < rows, dd, 0.0)

        out_ref[...] += dd   # pure VPU elementwise accumulate (no XLU / scalar RMW)

    return mse_kernel


def pallas_mse(pred: jax.Array, tgt: jax.Array, tile_rows: int = DEFAULT_TILE_ROWS) -> jax.Array:
    """Mean squared error over all elements (== torch.nn.MSELoss() mean reduction)."""
    assert pred.shape == tgt.shape, "MSELoss requires matching shapes"

    n = int(pred.size)
    p = jnp.ravel(pred)   # native dtype; f32 cast happens inside the kernel
    t = jnp.ravel(tgt)

    # Minimal padding: only up to the next multiple of 128 lanes (skipped when
    # the flattened size already divides 128, which is the common case).
    pad = (-n) % LANES
    if pad:
        p = jnp.pad(p, (0, pad))
        t = jnp.pad(t, (0, pad))
    rows = (n + pad) // LANES
    p2 = p.reshape(rows, LANES)
    t2 = t.reshape(rows, LANES)

    # Tile sizing: large streaming tiles, clamped for small inputs, multiple of 8.
    tr = min(tile_rows, _round_up(rows, SUBLANES))
    tr = max(SUBLANES, (tr // SUBLANES) * SUBLANES)

    nb = _cdiv(rows, tr)           # total row-blocks
    bpc = _cdiv(nb, NCORES)        # blocks per core (parallel axis slice)
    needs_mask = (NCORES * bpc * tr) != rows

    def in_map(c, i):
        # Clamp so the DMA always targets an in-range block; logically
        # out-of-range blocks are zeroed by the in-kernel row mask.
        return (jnp.minimum(c * bpc + i, nb - 1), 0)

    kernel = _make_mse_sum_kernel(tr, bpc, rows, needs_mask)

    partial = pl.pallas_call(
        kernel,
        out_shape=jax.ShapeDtypeStruct((NCORES * tr, LANES), jnp.float32),
        grid_spec=pltpu.PrefetchScalarGridSpec(
            num_scalar_prefetch=0,
            grid=(NCORES, bpc),
            in_specs=[
                pl.BlockSpec((tr, LANES), in_map),
                pl.BlockSpec((tr, LANES), in_map),
            ],
            out_specs=pl.BlockSpec((tr, LANES), lambda c, i: (c, 0)),
        ),
        compiler_params=pltpu.CompilerParams(
            # parallel axis -> both TensorCores on v7x; reduction axis last.
            dimension_semantics=("parallel", "arbitrary"),
        ),
    )(p2, t2)

    # Tiny final reduction + divide by the true element count (done once, in XLA).
    return jnp.sum(partial) / float(n)


class RegressorPallas:
    """JAX/Pallas counterpart of the PyTorch `Regressor` base class.

    The base class defines no parameters and an abstract forward; the concrete
    numerical compute it owns is the MSE criterion used by .test()/.fit().
    """

    def __init__(self):
        # Base Regressor has no learnable parameters.
        pass

    def forward(self, x):
        # Mirrors the PyTorch base class exactly (abstract).
        raise NotImplementedError

    def test(self, outputs, y):
        """Evaluate MSE between model outputs and groundtruth y (Pallas kernel)."""
        return pallas_mse(outputs, y)


if __name__ == "__main__":
    key = jax.random.PRNGKey(0)
    k1, k2 = jax.random.split(key)

    # Small shapes consistent with a forecasting regressor's output vs target.
    x_shape = (2, 4, 16, 16)  # NCHW-style; MSE flattens row-major internally.
    pred = jax.random.normal(k1, x_shape, dtype=jnp.float32)
    tgt = jax.random.normal(k2, x_shape, dtype=jnp.float32)

    model = RegressorPallas()
    loss = model.test(pred, tgt)
    loss = jax.block_until_ready(loss)

    # Cross-check against plain-JAX reference (same semantics as nn.MSELoss()).
    ref = jnp.mean((pred - tgt) ** 2)
    assert jnp.allclose(loss, ref, rtol=1e-5, atol=1e-6), (loss, ref)

    print("KERNEL_OK")
</pallas_src>

<mosaic_0001>
module attributes {stable_mosaic.version = 11 : i64} {
  func.func @mse_kernel(%arg0: i32, %arg1: i32, %arg2: memref<16x128xf32, #tpu.memory_space<vmem>>, %arg3: memref<16x128xf32, #tpu.memory_space<vmem>>, %arg4: memref<16x128xf32, #tpu.memory_space<vmem>>) attributes {dimension_semantics = [#tpu.dimension_semantics<parallel>, #tpu.dimension_semantics<arbitrary>], iteration_bounds = array<i64: 2, 1>, scalar_prefetch = 0 : i64, scratch_operands = 0 : i64, tpu.core_type = #tpu.core_type<tc>, window_params = [{transform_indices = @transform_0, window_bounds = array<i64: 16, 128>}, {transform_indices = @transform_1, window_bounds = array<i64: 16, 128>}, {transform_indices = @transform_2, window_bounds = array<i64: 16, 128>}]} {
    %c0_i32 = arith.constant 0 : i32
    %0 = arith.cmpi eq, %arg1, %c0_i32 : i32
    %1 = arith.extui %0 : i1 to i32
    %c0_i32_0 = arith.constant 0 : i32
    %2 = arith.cmpi ne, %1, %c0_i32_0 : i32
    scf.if %2 {
      %cst_9 = arith.constant 0.000000e+00 : f32
      %20 = vector.broadcast %cst_9 : f32 to vector<16x128xf32>
      %c0_10 = arith.constant 0 : index
      %c0_11 = arith.constant 0 : index
      %21 = vector.load %arg4[%c0_10, %c0_11] : memref<16x128xf32, #tpu.memory_space<vmem>>, vector<16x128xf32>
      tpu.vector_store %arg4[%c0_10, %c0_11], %20 {strides = array<i32>} : memref<16x128xf32, #tpu.memory_space<vmem>>, vector<16x128xf32>,
    } else {
    }
    %c0 = arith.constant 0 : index
    %c0_1 = arith.constant 0 : index
    %3 = vector.load %arg2[%c0, %c0_1] : memref<16x128xf32, #tpu.memory_space<vmem>>, vector<16x128xf32>
    %c0_2 = arith.constant 0 : index
    %c0_3 = arith.constant 0 : index
    %4 = vector.load %arg3[%c0_2, %c0_3] : memref<16x128xf32, #tpu.memory_space<vmem>>, vector<16x128xf32>
    %5 = arith.subf %3, %4 : vector<16x128xf32>
    %6 = arith.mulf %5, %5 : vector<16x128xf32>
    %7 = tpu.iota {dimensions = array<i32: 0>} : vector<16x128xi32>
    %c1_i32 = arith.constant 1 : i32
    %8 = arith.muli %arg0, %c1_i32 : i32
    %9 = arith.addi %8, %arg1 : i32
    %c16_i32 = arith.constant 16 : i32
    %10 = arith.muli %9, %c16_i32 : i32
    %11 = vector.broadcast %10 : i32 to vector<16x128xi32>
    %12 = arith.addi %11, %7 : vector<16x128xi32>
    %c16_i32_4 = arith.constant 16 : i32
    %13 = vector.broadcast %c16_i32_4 : i32 to vector<16x128xi32>
    %14 = arith.cmpi slt, %12, %13 : vector<16x128xi32>
    %cst = arith.constant 0.000000e+00 : f32
    %15 = vector.broadcast %cst : f32 to vector<16x128xf32>
    %16 = arith.select %14, %6, %15 : vector<16x128xi1>, vector<16x128xf32>
    %c0_5 = arith.constant 0 : index
    %c0_6 = arith.constant 0 : index
    %17 = vector.load %arg4[%c0_5, %c0_6] : memref<16x128xf32, #tpu.memory_space<vmem>>, vector<16x128xf32>
    %18 = arith.addf %17, %16 : vector<16x128xf32>
    %c0_7 = arith.constant 0 : index
    %c0_8 = arith.constant 0 : index
    %19 = vector.load %arg4[%c0_7, %c0_8] : memref<16x128xf32, #tpu.memory_space<vmem>>, vector<16x128xf32>
    tpu.vector_store %arg4[%c0_7, %c0_8], %18 {strides = array<i32>} : memref<16x128xf32, #tpu.memory_space<vmem>>, vector<16x128xf32>,
    return
  }
  func.func @transform_0(%arg0: i32, %arg1: i32) -> (i32, i32) {
    %c1_i32 = arith.constant 1 : i32
    %0 = arith.muli %arg0, %c1_i32 : i32
    %1 = arith.addi %0, %arg1 : i32
    %c0_i32 = arith.constant 0 : i32
    %2 = arith.minsi %1, %c0_i32 : i32
    %c0_i32_0 = arith.constant 0 : i32
    %c0_i32_1 = arith.constant 0 : i32
    return %2, %c0_i32_0 : i32, i32
  }
  func.func @transform_1(%arg0: i32, %arg1: i32) -> (i32, i32) {
    %c1_i32 = arith.constant 1 : i32
    %0 = arith.muli %arg0, %c1_i32 : i32
    %1 = arith.addi %0, %arg1 : i32
    %c0_i32 = arith.constant 0 : i32
    %2 = arith.minsi %1, %c0_i32 : i32
    %c0_i32_0 = arith.constant 0 : i32
    %c0_i32_1 = arith.constant 0 : i32
    return %2, %c0_i32_0 : i32, i32
  }
  func.func @transform_2(%arg0: i32, %arg1: i32) -> (i32, i32) {
    %c0_i32 = arith.constant 0 : i32
    %c0_i32_0 = arith.constant 0 : i32
    return %arg0, %c0_i32 : i32, i32
  }
}

</mosaic_0001>

<bundles_post_ra>
// kernel: tpu_custom_call.1
= control target key start
LH: loop header
LB: loop body
LE: loop exit
PB: predicated region body
PF: predicated region fallthrough
CT: control target
= control target key end

     0   :  { %7 = vsyncpa [#allocation3], 0  ;;  %s889_s0 = inlined_call_operand.hbm [shape: f32[16,128], index: 0, kind: input, shape index: {}]   ;;  %s890_s1 = inlined_call_operand.hbm [shape: f32[16,128], index: 1, kind: input, shape index: {}]   ;;  %s891_s2 = inlined_call_operand.hbm [shape: f32[32,128], index: 2, kind: output, shape index: {}]  }
   0x1   :  { %9 = vsyncpa [#allocation3 + $0x1], 0 }
   0x2   :  { %10 = vsyncpa [#allocation6], 0 }
   0x3   :  { %12 = vsyncpa [#allocation6 + $0x1], 0 }
   0x4   :  { %13 = vsyncpa [#allocation4], 0 }
   0x5   :  { %15 = vsyncpa [#allocation4 + $0x1], 0  ;;  %s695_s9 = smov 0   ;;  %s697_s10 = smov 0  }
   0x6   :  { %s699_s11 = smov 0   ;;  %s701_s12 = smov 0  }
   0x7   :  { %s703_s13 = smov 0   ;;  %s705_s14 = smov 0  }
   0x8   :  { %s707_s15 = smov 0   ;;  %s709_s16 = smov 0  }
   0x9 LB: > { %s391_s17 = sadd.s32 4294967295, %s671_s16   ;;  %s392_s18 = sadd.s32 4294967294, %s671_s16   ;;  %s671_s16 = sphi %s709_s16, %s21_s16   ;;  %s667_s15 = sphi %s707_s15, %s910_s15   ;;  %s663_s14 = sphi %s705_s14, %s909_s14   ;;  %s659_s13 = sphi %s703_s13, %s879_s13   ;;  %s655_s12 = sphi %s701_s12, %s908_s12   ;;  %s651_s11 = sphi %s699_s11, %s907_s11   ;;  %s647_s10 = sphi %s697_s10, %s906_s10   ;;  %s643_s9 = sphi %s695_s9, %s905_s9  }
   0xa   : > { %s33_s19 = sadd.s32 1, %s667_s15  ;;  %p640_p1 = scmp.ne.s32.totalorder %s659_s13, 0 }
   0xb   : > { %p35_p0 = scmp.ge.s32.totalorder %s33_s19, 2  ;;  %p54_p2 = scmp.eq.s32.totalorder %s671_s16, 0 }
   0xc   : > { %p59_p3 = scmp.ne.s32.totalorder %s659_s13, %s655_s12  ;;  %p60_p5 = scmp.eq.s32.totalorder %s391_s17, 0 }
   0xd   : > { %s912_s19 = smov (%p35_p0, %s33_s19), 0  ;;  %p741_p4 = por %p640_p1, %p54_p2 }
   0xe   : > { %p745_p6 = por %p60_p5, %p59_p3  ;;  %s101_s22 = ssub.s32 %s667_s15, %s912_s19 }
   0xf   : > { %p102_p7 = scmp.eq.s32.totalorder %s101_s22, 0  ;;  %s104_s23 = sadd.s32 1, %s651_s11 }
  0x10   : > { %s895_s21 = scalar_select %p745_p6, 1, 0 }
  0x11   : > { %s753_s24 = scalar_select %p102_p7, %s651_s11, %s104_s23  }
  0x12   : > { %p114_p8 = scmp.ne.s32.totalorder %s651_s11, %s647_s10  ;;  %p115_p9 = scmp.eq.s32.totalorder %s391_s17, 1 }
  0x13   : > { %p120_p10 = scmp.ne.s32.totalorder %s647_s10, %s643_s9  ;;  %p121_p11 = scmp.eq.s32.totalorder %s392_s18, 1 }
  0x14   : > { %p759_p12 = por %p115_p9, %p114_p8  ;;  %p431_p1 = scmp.lt.s32.totalorder %s671_s16, 2 }
  0x15   : > { %p764_p0 = por %p121_p11, %p120_p10  ;;  %s673_s27 = smov [#allocation2]  }
  0x16   : > { %s896_s25 = scalar_select %p759_p12, 1, 0 }
  0x17   : > { %s897_s26 = scalar_select %p764_p0, 1, 0 }
  0x18   : > { %s155_s28 = sshll.u32 %s673_s27, 4  ;;  %p771_p2 = pnand %p431_p1, %p741_p4  ;;  %s156_s28 = int_to_ptr.vmem [resolvable:$true] %s155_s28 }
  0x19   : > { %s510_s4 = scalar_lea.hbm %s889_s0, 256 }
  0x1a   : > { %p511_p3 = scmp.ne.s32.totalorder %s889_s0, %s510_s4  ;;  %p512_p5 = pneg %p771_p2 }
  0x1b   : > { %p517_p8 = scmp.lt.s32.totalorder %s510_s4, %s510_s4 }
  0x1c   : > { %p513_p7 = pnand %p512_p5, %p511_p3 }
  0x1e   : > { %p514_p4 = pneg %p513_p7 }
  0x20   : > { %p519_p9 = pnand %p517_p8, %p514_p4 }
  0x22   : > { %522 = shalt.err (!%p519_p9)
}
  0x23   : > { %s523_s7 = scalar_lea.vmem %s156_s28, 256  ;;  %s530_s8 = scalar_lea.vmem %s156_s28, 512 }
  0x24   : > { %p524_p10 = scmp.ne.s32.totalorder %s156_s28, %s523_s7  ;;  %p531_p13 = scmp.lt.s32.totalorder %s156_s28, %s156_s28 }
  0x25   : > { %p532_p0 = scmp.lt.s32.totalorder %s530_s8, %s523_s7 }
  0x26   : > { %p526_p11 = pnand %p524_p10, %p512_p5 }
  0x27   : > { %p533_p12 = por %p532_p0, %p531_p13 }
  0x28   : > { %p527_p1 = pneg %p526_p11 }
  0x2a   : > { %p534_p6 = pnand %p533_p12, %p527_p1 }
  0x2c   : > { %537 = shalt.err (!%p534_p6)
}
  0x2d   : > { %s674_s12 = smov 128   ;;  %s675_s17 = smov 8  }
  0x2e   : > { %423 = dma.hbm_to_vmem [thread:$0]  (!%p771_p2), %s889_s0, 256, %s156_s28, [#allocation3], %s674_s12, %s674_s12, %s675_s17  }
  0x2f   : > { %p401_p3 = scmp.ge.s32.totalorder %s671_s16, 1  ;;  %p187_p7 = scmp.lt.s32.totalorder %s671_s16, 3 }
  0x30   : > { %s676_s23 = smov [#allocation5]   ;;  %s538_s4 = scalar_lea.hbm %s890_s1, 256 }
  0x31   : > { %p796_p4 = pnand %p401_p3, %p187_p7  ;;  %s179_s27 = sshll.u32 %s676_s23, 4  ;;  %s180_s27 = int_to_ptr.vmem [resolvable:$true] %s179_s27 }
  0x32   : > { %p539_p6 = scmp.ne.s32.totalorder %s890_s1, %s538_s4  ;;  %p545_p0 = scmp.lt.s32.totalorder %s538_s4, %s538_s4 }
  0x33   : > { %s899_s22 = scalar_select %p796_p4, 1, 0 }
  0x34   : > { %p541_p12 = pnand %p539_p6, %p512_p5 }
  0x36   : > { %p542_p13 = pneg %p541_p12 }
  0x38   : > { %p547_p8 = pnand %p545_p0, %p542_p13 }
  0x3a   : > { %550 = shalt.err (!%p547_p8)
}
  0x3b   : > { %s551_s28 = scalar_lea.vmem %s180_s27, 256  ;;  %s558_s7 = scalar_lea.vmem %s180_s27, 512 }
  0x3c   : > { %p552_p9 = scmp.ne.s32.totalorder %s180_s27, %s551_s28  ;;  %p559_p1 = scmp.lt.s32.totalorder %s180_s27, %s180_s27 }
  0x3d   : > { %p560_p3 = scmp.lt.s32.totalorder %s558_s7, %s551_s28 }
  0x3e   : > { %p554_p10 = pnand %p552_p9, %p512_p5 }
  0x3f   : > { %p561_p7 = por %p560_p3, %p559_p1 }
  0x40   : > { %p555_p11 = pneg %p554_p10 }
  0x42   : > { %p562_p4 = pnand %p561_p7, %p555_p11 }
  0x44   : > { %565 = shalt.err (!%p562_p4)
}
  0x45   : > { %426 = dma.hbm_to_vmem [thread:$0]  (!%p771_p2), %s890_s1, 256, %s180_s27, [#allocation6], %s674_s12, %s674_s12, %s675_s17  }
  0x46   : > { %p900_p6 = scmp.ne.s32.totalorder %s899_s22, 0 }
  0x47   : > { %s193_s20 = sand.u32 (!%p900_p6), 1, %s659_s13   ;;  %p901_p5 = scmp.ne.s32.totalorder (!%p900_p6), %s895_s21, 0 }
  0x48   : > { %191 = sbr.rel (%p900_p6) target bundleno = 107 (0x6b), region = 28  ;;  %s402_s23 = sshll.u32 (!%p900_p6), %s193_s20, 4 }
  0x49   : > { %s194_s30 = scalar_lea.sflag (!%p900_p6), [#allocation3], %s193_s20  ;;  %s197_s3 = scalar_lea.vmem (!%p900_p6), [#allocation2], %s402_s23 }
  0x4d   : > { %629 = dma.done.wait (%p901_p5), %s194_s30, 256  }
  0x4e   : > { %631 = vsyncadd (%p901_p5), %s194_s30, 4294967040  ;;  %s203_s29 = scalar_lea.sflag [#allocation6], %s193_s20  ;;  %s206_s4 = scalar_lea.vmem [#allocation5], %s402_s23 }
  0x4f   : > { %633 = dma.done.wait (%p901_p5), %s203_s29, 256  }
  0x50   : > { %635 = vsyncadd (%p901_p5), %s203_s29, 4294967040  ;;  %v255_v0 = vlaneseq  ;;  %s405_s12 = sshll.u32 %s663_s14, 4  ;;  %s229_s17 = sand.u32 1, %s647_s10   ;;  %v247_v6 = vld [vmem:[%s197_s3] sm:$0xff]  ;;  %v248_v8 = vld [vmem:[%s197_s3 + $0x8] sm:$0xff] }
  0x51   : > { %v260_v2 = vstv %s405_s12  ;;  %s404_s22 = sshll.u32 %s229_s17, 4  ;;  %v249_v7 = vld [vmem:[%s206_s4] sm:$0xff]  ;;  %v250_v10 = vld [vmem:[%s206_s4 + $0x8] sm:$0xff]  ;;  %s413_s21 = sshll.u32 %s663_s14, 8 }
  0x52   : > { %v256_v1 = vshrl.u32 %v255_v0, 7  ;;  %v251_v9 = vsub.f32 %v247_v6, %v249_v7  ;;  %v252_v11 = vsub.f32 %v248_v8, %v250_v10  ;;  %s231_s27 = scalar_lea.vmem [#allocation7], %s404_s22  ;;  %s834_s7 = scalar_lea.hbm %s891_s2, %s413_s21 }
  0x53   : > { %s287_s5 = sshll.u32 %s231_s27, 4  ;;  %s838_s8 = scalar_lea.sflag [#allocation4], %s229_s17  ;;  %s836_s5 = int_to_ptr.vmem [resolvable:$true] %s287_s5 }
  0x54   : > { %v257_v3 = vadd.s32 8, %v256_v1  ;;  %v261_v4 = vadd.s32 %v260_v2, %v256_v1  ;;  %v253_v12 = vmul.f32 %v251_v9, %v251_v9  ;;  %v254_v13 = vmul.f32 %v252_v11, %v252_v11  ;;  %s566_s14 = scalar_lea.vmem %s836_s5, 256  ;;  %p902_p4 = scmp.ne.s32.totalorder %s896_s25, 0 }
  0x55   : > { %p567_p2 = scmp.ne.s32.totalorder %s836_s5, %s566_s14  ;;  %s677_s18 = smov [#allocation7]  }
  0x56   : > { %v262_v5 = vadd.s32 %v260_v2, %v257_v3  ;;  %vm263_vm0 = vcmp.lt.s32.totalorder %v261_v4, 16  ;;  %s570_s20 = sshll.u32 %s677_s18, 4  ;;  %s571_s20 = int_to_ptr.vmem [resolvable:$false] %s570_s20 }
  0x57   : > { %v265_v14 = vsel %vm263_vm0, %v253_v12, 0.0  ;;  %p568_p12 = pnand %p567_p2, %p902_p4  ;;  %s572_s23 = scalar_lea.vmem %s571_s20, 512 }
  0x58   : > { %vm264_vm1 = vcmp.lt.s32.totalorder %v262_v5, 16  ;;  %271 = vst [vmem:[%s231_s27] sm:$0xff] %v265_v14  ;;  %p573_p0 = scmp.lt.s32.totalorder %s836_s5, %s571_s20  ;;  %p574_p8 = scmp.lt.s32.totalorder %s572_s23, %s566_s14 }
  0x59   : > { %v266_v15 = vsel %vm264_vm1, %v254_v13, 0.0  ;;  %p569_p13 = pneg %p568_p12 }
  0x5a   : > { %272 = vst [vmem:[%s231_s27 + $0x8] sm:$0xff] %v266_v15  ;;  %p575_p9 = por %p574_p8, %p573_p0 }
  0x5c   : > { %p576_p10 = pnand %p575_p9, %p569_p13 }
  0x5e   : > { %579 = shalt.err (!%p576_p10)
}
  0x5f   : > { %s580_s30 = scalar_lea.hbm %s834_s7, 256  ;;  %s584_s4 = scalar_lea.hbm %s891_s2, 512 }
  0x60   : > { %p581_p11 = scmp.ne.s32.totalorder %s834_s7, %s580_s30  ;;  %p585_p7 = scmp.lt.s32.totalorder %s834_s7, %s891_s2 }
  0x61   : > { %p586_p6 = scmp.lt.s32.totalorder %s584_s4, %s580_s30 }
  0x62   : > { %p582_p1 = pnand %p581_p11, %p902_p4 }
  0x63   : > { %p587_p5 = por %p586_p6, %p585_p7 }
  0x64   : > { %p583_p3 = pneg %p582_p1 }
  0x66   : > { %p588_p2 = pnand %p587_p5, %p583_p3 }
  0x68   : > { %591 = shalt.err (!%p588_p2)
}
  0x69   : > { %s678_s22 = smov 128   ;;  %s679_s21 = smov 8  }
  0x6a   : > { %418 = dma.vmem_to_hbm [thread:$0]  (%p902_p4), %s836_s5, 256, %s834_s7, %s838_s8, %s678_s22, %s678_s22, %s679_s21  }
  0x6b PF: > { %s302_s27 = sand.u32 1, %s643_s9   ;;  %p903_p12 = scmp.ne.s32.totalorder %s897_s26, 0 }
  0x6c   : > { %p904_p13 = scmp.ge.s32.totalorder %s671_s16, 2  ;;  %s303_s6 = scalar_lea.sflag [#allocation4], %s302_s27 }
  0x6e   : > { %p428_p0 = pnand %p904_p13, %p903_p12 }
  0x70   : > { %p429_p8 = pneg %p428_p0 }
  0x72   : > { %637 = dma.done.wait (%p429_p8), %s303_s6, 256  }
  0x73   : > { %639 = vsyncadd (%p429_p8), %s303_s6, 4294967040  ;;  %s21_s16 = sadd.s32 1, %s671_s16   ;;  %s905_s9 = smov %s647_s10 }
  0x74   : > { %p18_p9 = scmp.ge.s32.totalorder %s21_s16, 4   ;;  %s906_s10 = smov %s651_s11 }
  0x75   : > { %s907_s11 = smov %s753_s24  ;;  %s908_s12 = smov %s659_s13 }
  0x76   : > { %s879_s13 = smov 0   ;;  %s909_s14 = smov %s667_s15 }
  0x77   : > { %s910_s15 = smov %s912_s19  ;;  %20 = sbr.rel (!%p18_p9) target bundleno = 9 (0x9), region = 90 }
  0x7c   :  { %308 = vsyncpa [#allocation3], 1 }
  0x7d   :  { %310 = vsyncpa [#allocation3 + $0x1], 1 }
  0x7e   :  { %311 = vsyncpa [#allocation6], 1 }
  0x7f   :  { %313 = vsyncpa [#allocation6 + $0x1], 1 }
  0x80   :  { %314 = vsyncpa [#allocation4], 1 }
  0x81   :  { %316 = vsyncpa [#allocation4 + $0x1], 1 }

</bundles_post_ra>
